<compile_context>
chip_gen: v5e
topology: v5e:2x2
jax: 0.10.0
libtpu: 0.0.40
codegen_flags: <defaults>
</compile_context>

<pallas_src>
import math

import jax
import jax.numpy as jnp
from jax.experimental import pallas as pl
from jax.experimental.pallas import tpu as pltpu

# ---------------- configuration (small synthetic sizes) ----------------
B = 2              # batch size
C = 32             # feature_channel
H = W = 16         # feature_size (single, non-FPN level)
HW = H * W
IMG = 256.0        # input image size
K = 3              # anchors per location: scales (32, 64, 128), ratio 1.0
A = K * HW         # total anchors per image (ordering: k-major, then h, w)
REG_W = (1.0, 1.0, 1.0, 1.0)   # regression_weight
PRE_K = 32         # pre_nms_top_k
POST_K = 16        # post_nms_top_k
BBOX_XFORM_CLIP = math.log(1000.0 / 16.0)   # clamp on tw/th before exp
MXU_DTYPE = jnp.bfloat16


# ---------------- fused kernel: 3x3 conv + heads + anchor decode ----------------
def rpn_fused_kernel(patch_ref, w1t_ref, b1_ref, wh_ref, bh_ref, anc_ref,
                     score_ref, prop_ref):
    # 3x3 "same" conv as ONE im2col matmul: (C, 9C) @ (9C, H*W) on the MXU.
    hidden = jnp.dot(w1t_ref[...], patch_ref[...],
                     preferred_element_type=jnp.float32)
    hidden = jnp.maximum(hidden + b1_ref[...], 0.0)                   # ReLU

    # Fused 1x1 heads: rows [0:4K) = bbox deltas (component-major), [4K:5K) = cls.
    head = jnp.dot(wh_ref[...], hidden.astype(MXU_DTYPE),
                   preferred_element_type=jnp.float32) + bh_ref[...]  # (5K, HW)

    tx = head[0 * K:1 * K]                    # (K, HW)
    ty = head[1 * K:2 * K]
    tw = jnp.minimum(head[2 * K:3 * K], BBOX_XFORM_CLIP)
    th = jnp.minimum(head[3 * K:4 * K], BBOX_XFORM_CLIP)
    logits = head[4 * K:5 * K]                # (K, HW)

    # Raw logits; sigmoid is monotonic so top-k ranking is identical.
    score_ref[...] = logits

    # Anchor decode + clip. Anchors (4, K, HW): cx, cy, w, h.
    ax, ay, aw, ah = anc_ref[0], anc_ref[1], anc_ref[2], anc_ref[3]
    cx = ax + tx * aw
    cy = ay + ty * ah
    pw = aw * jnp.exp(tw)
    ph = ah * jnp.exp(th)
    x1 = jnp.clip(cx - 0.5 * pw, 0.0, IMG)
    y1 = jnp.clip(cy - 0.5 * ph, 0.0, IMG)
    x2 = jnp.clip(cx + 0.5 * pw, 0.0, IMG)
    y2 = jnp.clip(cy + 0.5 * ph, 0.0, IMG)

    # Proposals (x1, y1, w, h), written row-by-row, lane-dense over HW.
    prop_ref[0] = x1
    prop_ref[1] = y1
    prop_ref[2] = x2 - x1
    prop_ref[3] = y2 - y1


def rpn_head_and_decode(patches, w1t, b1t, w_head, b_head, anchors):
    const = lambda shape: pl.BlockSpec(shape, lambda b: (0,) * len(shape))
    return pl.pallas_call(
        rpn_fused_kernel,
        out_shape=(jax.ShapeDtypeStruct((B, K, HW), jnp.float32),
                   jax.ShapeDtypeStruct((B, 4, K, HW), jnp.float32)),
        grid=(B,),
        in_specs=[
            pl.BlockSpec((None, 9 * C, HW), lambda b: (b, 0, 0)),   # im2col patches
            const((C, 9 * C)),       # conv weight (im2col)
            const((C, 1)),           # conv bias
            const((5 * K, C)),       # fused head weight [bbox(12); cls(3)]
            const((5 * K, 1)),       # fused head bias
            const((4, K, HW)),       # anchors (cx, cy, w, h)
        ],
        out_specs=(pl.BlockSpec((None, K, HW), lambda b: (b, 0, 0)),
                   pl.BlockSpec((None, 4, K, HW), lambda b: (b, 0, 0, 0))),
        compiler_params=pltpu.CompilerParams(
            dimension_semantics=("parallel",)),
    )(patches, w1t, b1t, w_head, b_head, anchors)


# ---------------- wrapper-side prep (inside the same jit region) ----------------
def _im2col_nchw(x_nchw):
    """(B, C, H, W) -> (B, 9C, H*W) patch matrix, row order ((dy,dx), Cin)."""
    x = x_nchw.astype(jnp.float32)
    xp = jnp.pad(x, ((0, 0), (0, 0), (1, 1), (1, 1)))
    cols = [xp[:, :, dy:dy + H, dx:dx + W].reshape(B, C, HW)
            for dy in range(3) for dx in range(3)]
    return jnp.concatenate(cols, axis=1)


def _prep_weights(params):
    """Fold 3x3 conv into an im2col weight, fuse the two 1x1 heads, and fold
    1/regression_weight into the bbox-head weights."""
    w1, b1, wc, bc, wr, br = (params[k] for k in
                              ("w1", "b1", "wc", "bc", "wr", "br"))
    # (dy, dx, Cin, Cout) -> (Cout, 9*Cin); col order matches im2col rows.
    w1t = jnp.transpose(w1, (3, 0, 1, 2)).reshape(C, 9 * C)
    b1t = b1.reshape(C, 1)

    # bbox head: columns ordered (k, component) -> rows ordered (component, k),
    # scaled by 1/regression_weight (division folded into the matmul).
    inv_rw = jnp.repeat(1.0 / jnp.array(REG_W, jnp.float32), K).reshape(4 * K, 1)
    wrt = jnp.transpose(wr.reshape(C, K, 4), (2, 1, 0)).reshape(4 * K, C) * inv_rw
    brt = jnp.transpose(br.reshape(K, 4), (1, 0)).reshape(4 * K, 1) * inv_rw
    wct = jnp.transpose(wc, (1, 0))            # (K, C)
    bct = bc.reshape(K, 1)

    w_head = jnp.concatenate([wrt, wct], axis=0)      # (5K, C)
    b_head = jnp.concatenate([brt, bct], axis=0)      # (5K, 1)
    return w1t, b1t, w_head, b_head


def generate_anchors():
    """Anchors (cx, cy, w, h) laid out as (4, K, H*W), lane axis = H*W."""
    stride = IMG / H
    scales = jnp.array([32.0, 64.0, 128.0], jnp.float32)
    ys = (jnp.arange(H, dtype=jnp.float32) + 0.5) * stride
    xs = (jnp.arange(W, dtype=jnp.float32) + 0.5) * stride
    cy = jnp.broadcast_to(ys[:, None], (H, W)).reshape(HW)
    cx = jnp.broadcast_to(xs[None, :], (H, W)).reshape(HW)
    cx_k = jnp.broadcast_to(cx[None, :], (K, HW))
    cy_k = jnp.broadcast_to(cy[None, :], (K, HW))
    sz_k = jnp.broadcast_to(scales[:, None], (K, HW))
    return jnp.stack([cx_k, cy_k, sz_k, sz_k], axis=0)   # (4, K, HW)


def rpn_forward(x_nchw, params, mode="eval"):
    patches = _im2col_nchw(x_nchw).astype(MXU_DTYPE)
    w1t, b1t, w_head, b_head = _prep_weights(params)
    anchors = generate_anchors()

    scores, props = rpn_head_and_decode(
        patches, w1t.astype(MXU_DTYPE), b1t,
        w_head.astype(MXU_DTYPE), b_head, anchors)
    # scores: (B, K, HW) raw logits; props: (B, 4, K, HW) as (x1, y1, w, h).

    scores_flat = scores.reshape(B, A)                                 # (B, A)
    props_flat = jnp.transpose(props, (0, 2, 3, 1)).reshape(B, A, 4)   # (B, A, 4)

    # pre-NMS top-k by objectness, then post-NMS top-k.
    # TODO(synk): IoU-based NMS between pre_k and post_k not implemented.
    _, idx = jax.lax.top_k(scores_flat, PRE_K)                         # (B, PRE_K)
    top_props = jnp.take_along_axis(props_flat, idx[..., None], axis=1)
    proposals = top_props[:, :POST_K, :]                               # (B, POST_K, 4)

    losses = {}  # eval mode: training losses (BCE / SmoothL1 on sampled anchors) omitted
    return proposals, losses


def init_params(key):
    ks = jax.random.split(key, 6)
    s = 0.05
    return {
        "w1": jax.random.normal(ks[0], (3, 3, C, C), jnp.float32) * s,
        "b1": jax.random.normal(ks[1], (1, C), jnp.float32) * s,
        "wc": jax.random.normal(ks[2], (C, K), jnp.float32) * s,
        "bc": jax.random.normal(ks[3], (1, K), jnp.float32) * s,
        "wr": jax.random.normal(ks[4], (C, 4 * K), jnp.float32) * s,
        "br": jax.random.normal(ks[5], (1, 4 * K), jnp.float32) * s,
    }


if __name__ == "__main__":
    key = jax.random.PRNGKey(0)
    k_x, k_p = jax.random.split(key)
    # single feature level, NCHW like the PyTorch module's conv input
    x = jax.random.normal(k_x, (B, C, H, W), jnp.float32)
    params = init_params(k_p)

    proposals, losses = jax.jit(rpn_forward, static_argnames=("mode",))(
        x, params, mode="eval")
    proposals = jax.block_until_ready(proposals)

    assert proposals.shape == (B, POST_K, 4)
    assert bool(jnp.all(jnp.isfinite(proposals)))
    assert bool(jnp.all(proposals[..., 2:] >= 0.0))   # widths/heights non-negative
    print("KERNEL_OK")
</pallas_src>

<mosaic_0001>
module attributes {stable_mosaic.version = 11 : i64} {
  func.func @rpn_fused_kernel(%arg0: i32, %arg1: memref<1x288x256xbf16, #tpu.memory_space<vmem>>, %arg2: memref<32x288xbf16, #tpu.memory_space<vmem>>, %arg3: memref<32x1xf32, #tpu.memory_space<vmem>>, %arg4: memref<15x32xbf16, #tpu.memory_space<vmem>>, %arg5: memref<15x1xf32, #tpu.memory_space<vmem>>, %arg6: memref<4x3x256xf32, #tpu.memory_space<vmem>>, %arg7: memref<1x3x256xf32, #tpu.memory_space<vmem>>, %arg8: memref<1x4x3x256xf32, #tpu.memory_space<vmem>>) attributes {dimension_semantics = [#tpu.dimension_semantics<parallel>], iteration_bounds = array<i64: 2>, scalar_prefetch = 0 : i64, scratch_operands = 0 : i64, tpu.core_type = #tpu.core_type<tc>, window_params = [{transform_indices = @transform_0, window_bounds = array<i64: 1, 288, 256>}, {pipeline_mode = #tpu.pipeline_mode<synchronous>, transform_indices = @transform_1, window_bounds = array<i64: 32, 288>}, {pipeline_mode = #tpu.pipeline_mode<synchronous>, transform_indices = @transform_2, window_bounds = array<i64: 32, 1>}, {pipeline_mode = #tpu.pipeline_mode<synchronous>, transform_indices = @transform_3, window_bounds = array<i64: 15, 32>}, {pipeline_mode = #tpu.pipeline_mode<synchronous>, transform_indices = @transform_4, window_bounds = array<i64: 15, 1>}, {pipeline_mode = #tpu.pipeline_mode<synchronous>, transform_indices = @transform_5, window_bounds = array<i64: 4, 3, 256>}, {transform_indices = @transform_6, window_bounds = array<i64: 1, 3, 256>}, {transform_indices = @transform_7, window_bounds = array<i64: 1, 4, 3, 256>}]} {
    %c0 = arith.constant 0 : index
    %c0_0 = arith.constant 0 : index
    %0 = vector.load %arg2[%c0, %c0_0] : memref<32x288xbf16, #tpu.memory_space<vmem>>, vector<32x288xbf16>
    %c0_1 = arith.constant 0 : index
    %c0_2 = arith.constant 0 : index
    %c0_3 = arith.constant 0 : index
    %1 = vector.load %arg1[%c0_1, %c0_2, %c0_3] : memref<1x288x256xbf16, #tpu.memory_space<vmem>>, vector<1x288x256xbf16>
    %2 = vector.shape_cast %1 : vector<1x288x256xbf16> to vector<288x256xbf16>
    %cst = arith.constant dense<0.000000e+00> : vector<32x256xf32>
    %3 = tpu.matmul %0, %2, %cst {dimension_numbers = #tpu.dot_dimension_numbers<[1], [0], [0], [1], [0, 0, 1, 1], [], []>} : vector<32x288xbf16>, vector<288x256xbf16>, vector<32x256xf32> -> vector<32x256xf32>
    %c0_4 = arith.constant 0 : index
    %c0_5 = arith.constant 0 : index
    %4 = vector.load %arg3[%c0_4, %c0_5] : memref<32x1xf32, #tpu.memory_space<vmem>>, vector<32x1xf32>
    %5 = vector.broadcast %4 : vector<32x1xf32> to vector<32x256xf32>
    %6 = arith.addf %3, %5 : vector<32x256xf32>
    %cst_6 = arith.constant 0.000000e+00 : f32
    %7 = vector.broadcast %cst_6 : f32 to vector<32x256xf32>
    %8 = arith.maximumf %6, %7 : vector<32x256xf32>
    %c0_7 = arith.constant 0 : index
    %c0_8 = arith.constant 0 : index
    %9 = vector.load %arg4[%c0_7, %c0_8] : memref<15x32xbf16, #tpu.memory_space<vmem>>, vector<15x32xbf16>
    %10 = arith.truncf %8 : vector<32x256xf32> to vector<32x256xbf16>
    %cst_9 = arith.constant dense<0.000000e+00> : vector<15x256xf32>
    %11 = tpu.matmul %9, %10, %cst_9 {dimension_numbers = #tpu.dot_dimension_numbers<[1], [0], [0], [1], [0, 0, 1, 1], [], []>} : vector<15x32xbf16>, vector<32x256xbf16>, vector<15x256xf32> -> vector<15x256xf32>
    %c0_10 = arith.constant 0 : index
    %c0_11 = arith.constant 0 : index
    %12 = vector.load %arg5[%c0_10, %c0_11] : memref<15x1xf32, #tpu.memory_space<vmem>>, vector<15x1xf32>
    %13 = vector.broadcast %12 : vector<15x1xf32> to vector<15x256xf32>
    %14 = arith.addf %11, %13 : vector<15x256xf32>
    %15 = vector.extract_strided_slice %14 {offsets = [0, 0], sizes = [3, 256], strides = [1, 1]} : vector<15x256xf32> to vector<3x256xf32>
    %16 = vector.extract_strided_slice %14 {offsets = [3, 0], sizes = [3, 256], strides = [1, 1]} : vector<15x256xf32> to vector<3x256xf32>
    %17 = vector.extract_strided_slice %14 {offsets = [6, 0], sizes = [3, 256], strides = [1, 1]} : vector<15x256xf32> to vector<3x256xf32>
    %cst_12 = arith.constant 4.13516665 : f32
    %18 = vector.broadcast %cst_12 : f32 to vector<3x256xf32>
    %19 = arith.minimumf %17, %18 : vector<3x256xf32>
    %20 = vector.extract_strided_slice %14 {offsets = [9, 0], sizes = [3, 256], strides = [1, 1]} : vector<15x256xf32> to vector<3x256xf32>
    %cst_13 = arith.constant 4.13516665 : f32
    %21 = vector.broadcast %cst_13 : f32 to vector<3x256xf32>
    %22 = arith.minimumf %20, %21 : vector<3x256xf32>
    %23 = vector.extract_strided_slice %14 {offsets = [12, 0], sizes = [3, 256], strides = [1, 1]} : vector<15x256xf32> to vector<3x256xf32>
    %c0_14 = arith.constant 0 : index
    %c0_15 = arith.constant 0 : index
    %c0_16 = arith.constant 0 : index
    %24 = vector.load %arg7[%c0_14, %c0_15, %c0_16] : memref<1x3x256xf32, #tpu.memory_space<vmem>>, vector<1x3x256xf32>
    %25 = vector.shape_cast %24 : vector<1x3x256xf32> to vector<3x256xf32>
    %26 = vector.shape_cast %23 : vector<3x256xf32> to vector<1x3x256xf32>
    tpu.vector_store %arg7[%c0_14, %c0_15, %c0_16], %26 {strides = array<i32>} : memref<1x3x256xf32, #tpu.memory_space<vmem>>, vector<1x3x256xf32>,
    %c0_17 = arith.constant 0 : index
    %c0_18 = arith.constant 0 : index
    %c0_19 = arith.constant 0 : index
    %27 = vector.load %arg6[%c0_17, %c0_18, %c0_19] : memref<4x3x256xf32, #tpu.memory_space<vmem>>, vector<1x3x256xf32>
    %28 = vector.shape_cast %27 : vector<1x3x256xf32> to vector<3x256xf32>
    %c1 = arith.constant 1 : index
    %c0_20 = arith.constant 0 : index
    %c0_21 = arith.constant 0 : index
    %29 = vector.load %arg6[%c1, %c0_20, %c0_21] : memref<4x3x256xf32, #tpu.memory_space<vmem>>, vector<1x3x256xf32>
    %30 = vector.shape_cast %29 : vector<1x3x256xf32> to vector<3x256xf32>
    %c2 = arith.constant 2 : index
    %c0_22 = arith.constant 0 : index
    %c0_23 = arith.constant 0 : index
    %31 = vector.load %arg6[%c2, %c0_22, %c0_23] : memref<4x3x256xf32, #tpu.memory_space<vmem>>, vector<1x3x256xf32>
    %32 = vector.shape_cast %31 : vector<1x3x256xf32> to vector<3x256xf32>
    %c3 = arith.constant 3 : index
    %c0_24 = arith.constant 0 : index
    %c0_25 = arith.constant 0 : index
    %33 = vector.load %arg6[%c3, %c0_24, %c0_25] : memref<4x3x256xf32, #tpu.memory_space<vmem>>, vector<1x3x256xf32>
    %34 = vector.shape_cast %33 : vector<1x3x256xf32> to vector<3x256xf32>
    %35 = arith.mulf %15, %32 : vector<3x256xf32>
    %36 = arith.addf %28, %35 : vector<3x256xf32>
    %37 = arith.mulf %16, %34 : vector<3x256xf32>
    %38 = arith.addf %30, %37 : vector<3x256xf32>
    %39 = math.exp %19 : vector<3x256xf32>
    %40 = arith.mulf %32, %39 : vector<3x256xf32>
    %41 = math.exp %22 : vector<3x256xf32>
    %42 = arith.mulf %34, %41 : vector<3x256xf32>
    %cst_26 = arith.constant 5.000000e-01 : f32
    %43 = vector.broadcast %cst_26 : f32 to vector<3x256xf32>
    %44 = arith.mulf %43, %40 : vector<3x256xf32>
    %45 = arith.subf %36, %44 : vector<3x256xf32>
    %cst_27 = arith.constant 0.000000e+00 : f32
    %cst_28 = arith.constant 2.560000e+02 : f32
    %46 = vector.broadcast %cst_27 : f32 to vector<3x256xf32>
    %47 = arith.maximumf %46, %45 : vector<3x256xf32>
    %48 = vector.broadcast %cst_28 : f32 to vector<3x256xf32>
    %49 = arith.minimumf %48, %47 : vector<3x256xf32>
    %cst_29 = arith.constant 5.000000e-01 : f32
    %50 = vector.broadcast %cst_29 : f32 to vector<3x256xf32>
    %51 = arith.mulf %50, %42 : vector<3x256xf32>
    %52 = arith.subf %38, %51 : vector<3x256xf32>
    %cst_30 = arith.constant 0.000000e+00 : f32
    %cst_31 = arith.constant 2.560000e+02 : f32
    %53 = vector.broadcast %cst_30 : f32 to vector<3x256xf32>
    %54 = arith.maximumf %53, %52 : vector<3x256xf32>
    %55 = vector.broadcast %cst_31 : f32 to vector<3x256xf32>
    %56 = arith.minimumf %55, %54 : vector<3x256xf32>
    %cst_32 = arith.constant 5.000000e-01 : f32
    %57 = vector.broadcast %cst_32 : f32 to vector<3x256xf32>
    %58 = arith.mulf %57, %40 : vector<3x256xf32>
    %59 = arith.addf %36, %58 : vector<3x256xf32>
    %cst_33 = arith.constant 0.000000e+00 : f32
    %cst_34 = arith.constant 2.560000e+02 : f32
    %60 = vector.broadcast %cst_33 : f32 to vector<3x256xf32>
    %61 = arith.maximumf %60, %59 : vector<3x256xf32>
    %62 = vector.broadcast %cst_34 : f32 to vector<3x256xf32>
    %63 = arith.minimumf %62, %61 : vector<3x256xf32>
    %cst_35 = arith.constant 5.000000e-01 : f32
    %64 = vector.broadcast %cst_35 : f32 to vector<3x256xf32>
    %65 = arith.mulf %64, %42 : vector<3x256xf32>
    %66 = arith.addf %38, %65 : vector<3x256xf32>
    %cst_36 = arith.constant 0.000000e+00 : f32
    %cst_37 = arith.constant 2.560000e+02 : f32
    %67 = vector.broadcast %cst_36 : f32 to vector<3x256xf32>
    %68 = arith.maximumf %67, %66 : vector<3x256xf32>
    %69 = vector.broadcast %cst_37 : f32 to vector<3x256xf32>
    %70 = arith.minimumf %69, %68 : vector<3x256xf32>
    %c0_38 = arith.constant 0 : index
    %c0_39 = arith.constant 0 : index
    %c0_40 = arith.constant 0 : index
    %c0_41 = arith.constant 0 : index
    %71 = vector.load %arg8[%c0_38, %c0_39, %c0_40, %c0_41] : memref<1x4x3x256xf32, #tpu.memory_space<vmem>>, vector<1x1x3x256xf32>
    %72 = vector.shape_cast %71 : vector<1x1x3x256xf32> to vector<3x256xf32>
    %73 = vector.shape_cast %49 : vector<3x256xf32> to vector<1x1x3x256xf32>
    tpu.vector_store %arg8[%c0_38, %c0_39, %c0_40, %c0_41], %73 {strides = array<i32>} : memref<1x4x3x256xf32, #tpu.memory_space<vmem>>, vector<1x1x3x256xf32>,
    %c0_42 = arith.constant 0 : index
    %c1_43 = arith.constant 1 : index
    %c0_44 = arith.constant 0 : index
    %c0_45 = arith.constant 0 : index
    %74 = vector.load %arg8[%c0_42, %c1_43, %c0_44, %c0_45] : memref<1x4x3x256xf32, #tpu.memory_space<vmem>>, vector<1x1x3x256xf32>
    %75 = vector.shape_cast %74 : vector<1x1x3x256xf32> to vector<3x256xf32>
    %76 = vector.shape_cast %56 : vector<3x256xf32> to vector<1x1x3x256xf32>
    tpu.vector_store %arg8[%c0_42, %c1_43, %c0_44, %c0_45], %76 {strides = array<i32>} : memref<1x4x3x256xf32, #tpu.memory_space<vmem>>, vector<1x1x3x256xf32>,
    %77 = arith.subf %63, %49 : vector<3x256xf32>
    %c0_46 = arith.constant 0 : index
    %c2_47 = arith.constant 2 : index
    %c0_48 = arith.constant 0 : index
    %c0_49 = arith.constant 0 : index
    %78 = vector.load %arg8[%c0_46, %c2_47, %c0_48, %c0_49] : memref<1x4x3x256xf32, #tpu.memory_space<vmem>>, vector<1x1x3x256xf32>
    %79 = vector.shape_cast %78 : vector<1x1x3x256xf32> to vector<3x256xf32>
    %80 = vector.shape_cast %77 : vector<3x256xf32> to vector<1x1x3x256xf32>
    tpu.vector_store %arg8[%c0_46, %c2_47, %c0_48, %c0_49], %80 {strides = array<i32>} : memref<1x4x3x256xf32, #tpu.memory_space<vmem>>, vector<1x1x3x256xf32>,
    %81 = arith.subf %70, %56 : vector<3x256xf32>
    %c0_50 = arith.constant 0 : index
    %c3_51 = arith.constant 3 : index
    %c0_52 = arith.constant 0 : index
    %c0_53 = arith.constant 0 : index
    %82 = vector.load %arg8[%c0_50, %c3_51, %c0_52, %c0_53] : memref<1x4x3x256xf32, #tpu.memory_space<vmem>>, vector<1x1x3x256xf32>
    %83 = vector.shape_cast %82 : vector<1x1x3x256xf32> to vector<3x256xf32>
    %84 = vector.shape_cast %81 : vector<3x256xf32> to vector<1x1x3x256xf32>
    tpu.vector_store %arg8[%c0_50, %c3_51, %c0_52, %c0_53], %84 {strides = array<i32>} : memref<1x4x3x256xf32, #tpu.memory_space<vmem>>, vector<1x1x3x256xf32>,
    return
  }
  func.func @transform_0(%arg0: i32) -> (i32, i32, i32) {
    %c0_i32 = arith.constant 0 : i32
    %c0_i32_0 = arith.constant 0 : i32
    %c0_i32_1 = arith.constant 0 : i32
    return %arg0, %c0_i32, %c0_i32_0 : i32, i32, i32
  }
  func.func @transform_1(%arg0: i32) -> (i32, i32) {
    %c0_i32 = arith.constant 0 : i32
    %c0_i32_0 = arith.constant 0 : i32
    %c0_i32_1 = arith.constant 0 : i32
    return %c0_i32, %c0_i32_0 : i32, i32
  }
  func.func @transform_2(%arg0: i32) -> (i32, i32) {
    %c0_i32 = arith.constant 0 : i32
    %c0_i32_0 = arith.constant 0 : i32
    %c0_i32_1 = arith.constant 0 : i32
    return %c0_i32, %c0_i32_0 : i32, i32
  }
  func.func @transform_3(%arg0: i32) -> (i32, i32) {
    %c0_i32 = arith.constant 0 : i32
    %c0_i32_0 = arith.constant 0 : i32
    %c0_i32_1 = arith.constant 0 : i32
    return %c0_i32, %c0_i32_0 : i32, i32
  }
  func.func @transform_4(%arg0: i32) -> (i32, i32) {
    %c0_i32 = arith.constant 0 : i32
    %c0_i32_0 = arith.constant 0 : i32
    %c0_i32_1 = arith.constant 0 : i32
    return %c0_i32, %c0_i32_0 : i32, i32
  }
  func.func @transform_5(%arg0: i32) -> (i32, i32, i32) {
    %c0_i32 = arith.constant 0 : i32
    %c0_i32_0 = arith.constant 0 : i32
    %c0_i32_1 = arith.constant 0 : i32
    %c0_i32_2 = arith.constant 0 : i32
    return %c0_i32, %c0_i32_0, %c0_i32_1 : i32, i32, i32
  }
  func.func @transform_6(%arg0: i32) -> (i32, i32, i32) {
    %c0_i32 = arith.constant 0 : i32
    %c0_i32_0 = arith.constant 0 : i32
    %c0_i32_1 = arith.constant 0 : i32
    return %arg0, %c0_i32, %c0_i32_0 : i32, i32, i32
  }
  func.func @transform_7(%arg0: i32) -> (i32, i32, i32, i32) {
    %c0_i32 = arith.constant 0 : i32
    %c0_i32_0 = arith.constant 0 : i32
    %c0_i32_1 = arith.constant 0 : i32
    %c0_i32_2 = arith.constant 0 : i32
    return %arg0, %c0_i32, %c0_i32_0, %c0_i32_1 : i32, i32, i32, i32
  }
}

</mosaic_0001>

<bundles_post_ra>
// kernel: rpn_forward.1
= control target key start
LH: loop header
LB: loop body
LE: loop exit
PB: predicated region body
PF: predicated region fallthrough
CT: control target
= control target key end

     0   :  { %s1276_s24 = smov 0   ;;  %s1466_s0 = inlined_call_operand.vmem [shape: bf16[2,288,256], index: 0, kind: input, shape index: {}]   ;;  %s1467_s1 = inlined_call_operand.vmem [shape: bf16[32,288], index: 1, kind: input, shape index: {}]   ;;  %s1468_s2 = inlined_call_operand.vmem [shape: f32[32,1], index: 2, kind: input, shape index: {}]   ;;  %s1469_s3 = inlined_call_operand.vmem [shape: bf16[15,32], index: 3, kind: input, shape index: {}]   ;;  %s1470_s4 = inlined_call_operand.vmem [shape: f32[15,1], index: 4, kind: input, shape index: {}]   ;;  %s1471_s5 = inlined_call_operand.vmem [shape: f32[4,3,256], index: 5, kind: input, shape index: {}]   ;;  %s1472_s6 = inlined_call_operand.vmem [shape: f32[2,3,256], index: 6, kind: output, shape index: {0}]   ;;  %s1473_s7 = inlined_call_operand.vmem [shape: f32[2,4,3,256], index: 7, kind: output, shape index: {1}]  }
   0x1 LB: > { %s959_s25 = sadd.s32 4294967295, %s1233_s24   ;;  %p963_p0 = scmp.ge.s32.totalorder %s1233_s24, 1  ;;  %s1233_s24 = sphi %s1276_s24, %s18_s24  }
   0x2   : > { %p240_p1 = scmp.lt.s32.totalorder %s1233_s24, 3 }
   0x4   : > { %p241_p2 = pnand %p963_p0, %p240_p1 }
   0x5   : > { %p277_p3 = scmp.lt.s32.totalorder (!%p241_p2), %s959_s25, 1 }
   0x6   : > { %244 = sbr.rel (%p241_p2) target bundleno = 428 (0x1ac), region = 44 }
   0xb   : > { %s1475_s25 = smov (!%p277_p3, %s959_s25), 1  ;;  %vm571_vm0 = vcmask 261120   ;;  %v979_v12 = vld [vmem:[%s1467_s1 + $0x8] sm:$0xf]  ;;  %v1163_v13 = vld [vmem:[%s1467_s1 + $0x10] sm:$0xf0] }
   0xc   : > { %s1206_s26 = smul.u32 288, %s1475_s25  ;;  %v1319_v31 = vor.u32 %v1163_v13, %v979_v12  ;;  %s1159_s28 = sshll.u32 %s1475_s25, 3  ;;  %vm784_vm1 = vcmask 1043456   ;;  %vm804_vm2 = vcmask 1040384   ;;  %vm805_vm3 = vcmask 1044484  }
   0xd   : > { %s286_s9 = scalar_lea.vmem %s1472_s6, %s1159_s28  ;;  %vm833_vm4 = vcmask 1041408   ;;  %vm834_vm5 = vcmask 1045508   ;;  %vm806_vm6 = vmor %vm804_vm2, %vm805_vm3  ;;  %s1160_s15 = sshll.u32 %s1475_s25, 5 }
   0xe   : > { %s1290_s29 = scalar_lea.vmem %s1466_s0, %s1206_s26  ;;  %vm835_vm7 = vmor %vm833_vm4, %vm834_vm5  ;;  %s291_s18 = scalar_lea.vmem %s1473_s7, %s1160_s15 }
   0xf   : > { %v1051_v0 = vld [vmem:[%s1290_s29 + $0x70] sm:$0xf]  ;;  %v1182_v1 = vld [vmem:[%s1290_s29 + $0x74] sm:$0xf0]  ;;  %v1043_v9 = vld [vmem:[%s1290_s29 + $0x60] sm:$0xf] }
  0x10   : > { %v1131_v2 = vld [vmem:[%s1290_s29 + $0x110] sm:$0xf]  ;;  %v1052_v3 = vor.u32 %v1182_v1, %v1051_v0  ;;  %v1202_v4 = vld [vmem:[%s1290_s29 + $0x114] sm:$0xf0]  ;;  %v1180_v10 = vld [vmem:[%s1290_s29 + $0x64] sm:$0xf0] }
  0x11   : > { %v1115_v5 = vld [vmem:[%s1290_s29 + $0xf0] sm:$0xf]  ;;  %v1198_v6 = vld [vmem:[%s1290_s29 + $0xf4] sm:$0xf0]  ;;  %v1132_v7 = vor.u32 %v1202_v4, %v1131_v2  ;;  %v1123_v11 = vld [vmem:[%s1290_s29 + $0x100] sm:$0xf]  ;;  %v1044_v14 = vor.u32 %v1180_v10, %v1043_v9 }
  0x12   : > { %v1116_v8 = vor.u32 %v1198_v6, %v1115_v5  ;;  %578 = vmatpush.bf16.msra.mxu0 %v1052_v3  ;;  %v1200_v15 = vld [vmem:[%s1290_s29 + $0x104] sm:$0xf0]  ;;  %v1107_v16 = vld [vmem:[%s1290_s29 + $0xe0] sm:$0xf]  ;;  %v1181_v20 = vld [vmem:[%s1290_s29 + $0x74] sm:$0xf] }
  0x13   : > { %v1196_v17 = vld [vmem:[%s1290_s29 + $0xe4] sm:$0xf0]  ;;  %622 = vmatpush.bf16.msra.mxu2 %v1132_v7  ;;  %v1124_v18 = vor.u32 %v1200_v15, %v1123_v11  ;;  %v1053_v21 = vld [vmem:[%s1290_s29 + $0x78] sm:$0xf0]  ;;  %v1035_v22 = vld [vmem:[%s1290_s29 + $0x50] sm:$0xf] }
  0x14   : > { %597 = vmatpush.bf16.msra.mxu1 %v1116_v8  ;;  %v1108_v19 = vor.u32 %v1196_v17, %v1107_v16  ;;  %v1056_v23 = vor.u32 %v1181_v20, %v1053_v21  ;;  %v1178_v24 = vld [vmem:[%s1290_s29 + $0x54] sm:$0xf0]  ;;  %v1197_v25 = vld [vmem:[%s1290_s29 + $0xf4] sm:$0xf]  ;;  %v1117_v26 = vld [vmem:[%s1290_s29 + $0xf8] sm:$0xf0] }
  0x15   : > { %v1120_v27 = vor.u32 %v1197_v25, %v1117_v26  ;;  %v1099_v28 = vld [vmem:[%s1290_s29 + $0xd0] sm:$0xf]  ;;  %v1194_v29 = vld [vmem:[%s1290_s29 + $0xd4] sm:$0xf0]  ;;  %v1179_v30 = vld [vmem:[%s1290_s29 + $0x64] sm:$0xf]  ;;  %v1036_v32 = vor.u32 %v1178_v24, %v1035_v22 }
  0x16   : > { %579 = vmatpush.bf16.msra.mxu0 %v1044_v14  ;;  %635 = vmatpush.bf16.msra.mxu3 %v1056_v23  ;;  %v1045_v33 = vld [vmem:[%s1290_s29 + $0x68] sm:$0xf0]  ;;  %v1027_v34 = vld [vmem:[%s1290_s29 + $0x40] sm:$0xf]  ;;  %v1176_v35 = vld [vmem:[%s1290_s29 + $0x44] sm:$0xf0]  ;;  %v1100_v36 = vor.u32 %v1194_v29, %v1099_v28 }
  0x17   : > { %623 = vmatpush.bf16.msra.mxu2 %v1124_v18  ;;  %v1048_v37 = vor.u32 %v1179_v30, %v1045_v33  ;;  %v1195_v38 = vld [vmem:[%s1290_s29 + $0xe4] sm:$0xf]  ;;  %v1109_v39 = vld [vmem:[%s1290_s29 + $0xe8] sm:$0xf0]  ;;  %v1091_v40 = vld [vmem:[%s1290_s29 + $0xc0] sm:$0xf]  ;;  %v1028_v46 = vor.u32 %v1176_v35, %v1027_v34 }
  0x18   : > { %598 = vmatpush.bf16.msra.mxu1 %v1108_v19  ;;  %v1112_v41 = vor.u32 %v1195_v38, %v1109_v39  ;;  %v1192_v42 = vld [vmem:[%s1290_s29 + $0xc4] sm:$0xf0]  ;;  %v1177_v43 = vld [vmem:[%s1290_s29 + $0x54] sm:$0xf]  ;;  %v1037_v44 = vld [vmem:[%s1290_s29 + $0x58] sm:$0xf0] }
  0x19   : > { %v1193_v45 = vld [vmem:[%s1290_s29 + $0xd4] sm:$0xf]  ;;  %v1101_v47 = vld [vmem:[%s1290_s29 + $0xd8] sm:$0xf0]  ;;  %v1092_v48 = vor.u32 %v1192_v42, %v1091_v40  ;;  %v1040_v49 = vor.u32 %v1177_v43, %v1037_v44  ;;  %v1019_v50 = vld [vmem:[%s1290_s29 + $0x30] sm:$0xf] }
  0x1a   : > { %1137 = vmatmul.msk.bf16.vlgmr.msra.gmra.mxu2 %vm571_vm0, %v1319_v31  ;;  %580 = vmatpush.bf16.msra.mxu0 %v1036_v32  ;;  %v1174_v51 = vld [vmem:[%s1290_s29 + $0x34] sm:$0xf0]  ;;  %v1083_v52 = vld [vmem:[%s1290_s29 + $0xb0] sm:$0xf]  ;;  %v1104_v53 = vor.u32 %v1193_v45, %v1101_v47  ;;  %v1175_v55 = vld [vmem:[%s1290_s29 + $0x44] sm:$0xf] }
  0x1b   : > { %654 = vmatpush.bf16.msrb.mxu2 %v1120_v27  ;;  %636 = vmatpush.bf16.msra.mxu3 %v1048_v37  ;;  %v1190_v54 = vld [vmem:[%s1290_s29 + $0xb4] sm:$0xf0]  ;;  %v1029_v56 = vld [vmem:[%s1290_s29 + $0x48] sm:$0xf0]  ;;  %v1191_v57 = vld [vmem:[%s1290_s29 + $0xc4] sm:$0xf]  ;;  %v1020_v59 = vor.u32 %v1174_v51, %v1019_v50 }
  0x1c   : > { %599 = vmatpush.bf16.msra.mxu1 %v1100_v36  ;;  %v1093_v58 = vld [vmem:[%s1290_s29 + $0xc8] sm:$0xf0]  ;;  %v1084_v60 = vor.u32 %v1190_v54, %v1083_v52  ;;  %v1032_v61 = vor.u32 %v1175_v55, %v1029_v56  ;;  %v1011_v62 = vld [vmem:[%s1290_s29 + $0x20] sm:$0xf]  ;;  %v1172_v63 = vld [vmem:[%s1290_s29 + $0x24] sm:$0xf0] }
  0x1d   : > { %v1075_v0 = vld [vmem:[%s1290_s29 + $0xa0] sm:$0xf]  ;;  %v1096_v1 = vor.u32 %v1191_v57, %v1093_v58  ;;  %v1188_v2 = vld [vmem:[%s1290_s29 + $0xa4] sm:$0xf0]  ;;  %v1173_v3 = vld [vmem:[%s1290_s29 + $0x34] sm:$0xf]  ;;  %v1012_v7 = vor.u32 %v1172_v63, %v1011_v62 }
  0x1e   : > { %581 = vmatpush.bf16.msra.mxu0 %v1028_v46  ;;  %v1021_v4 = vld [vmem:[%s1290_s29 + $0x38] sm:$0xf0]  ;;  %v1189_v5 = vld [vmem:[%s1290_s29 + $0xb4] sm:$0xf]  ;;  %v991_v8 = vld [vmem:[%s1467_s1 + $0x20] sm:$0xf]  ;;  %v1076_v10 = vor.u32 %v1188_v2, %v1075_v0 }
  0x1f   : > { %655 = vmatpush.bf16.msrb.mxu2 %v1112_v41  ;;  %637 = vmatpush.bf16.msra.mxu3 %v1040_v49  ;;  %v1085_v6 = vld [vmem:[%s1290_s29 + $0xb8] sm:$0xf0]  ;;  %v1166_v9 = vld [vmem:[%s1467_s1 + $0x28] sm:$0xf0]  ;;  %v1024_v11 = vor.u32 %v1173_v3, %v1021_v4  ;;  %v1003_v12 = vld [vmem:[%s1290_s29 + $0x10] sm:$0xf] }
  0x20   : > { %600 = vmatpush.bf16.msra.mxu1 %v1092_v48  ;;  %v1170_v13 = vld [vmem:[%s1290_s29 + $0x14] sm:$0xf0]  ;;  %v1067_v14 = vld [vmem:[%s1290_s29 + $0x90] sm:$0xf]  ;;  %v1088_v15 = vor.u32 %v1189_v5, %v1085_v6  ;;  %v1171_v17 = vld [vmem:[%s1290_s29 + $0x24] sm:$0xf]  ;;  %v1364_v21 = vor.u32 %v1166_v9, %v991_v8 }
  0x21   : > { %v1186_v16 = vld [vmem:[%s1290_s29 + $0x94] sm:$0xf0]  ;;  %v1013_v18 = vld [vmem:[%s1290_s29 + $0x28] sm:$0xf0]  ;;  %v1187_v19 = vld [vmem:[%s1290_s29 + $0xa4] sm:$0xf]  ;;  %v1004_v22 = vor.u32 %v1170_v13, %v1003_v12 }
  0x22   : > { %582 = vmatpush.bf16.msra.mxu0 %v1020_v59  ;;  %v1077_v20 = vld [vmem:[%s1290_s29 + $0xa8] sm:$0xf0]  ;;  %v995_v23 = vld [vmem:[%s1290_s29] sm:$0xf]  ;;  %v1168_v24 = vld [vmem:[%s1290_s29 + $0x4] sm:$0xf0]  ;;  %v1068_v25 = vor.u32 %v1186_v16, %v1067_v14  ;;  %v1016_v26 = vor.u32 %v1171_v17, %v1013_v18 }
  0x23   : > { %656 = vmatpush.bf16.msrb.mxu2 %v1104_v53  ;;  %638 = vmatpush.bf16.msra.mxu3 %v1032_v61  ;;  %v1059_v27 = vld [vmem:[%s1290_s29 + $0x80] sm:$0xf]  ;;  %v1184_v28 = vld [vmem:[%s1290_s29 + $0x84] sm:$0xf0]  ;;  %v1080_v30 = vor.u32 %v1187_v19, %v1077_v20  ;;  %v1169_v32 = vld [vmem:[%s1290_s29 + $0x14] sm:$0xf]  ;;  %v996_v39 = vor.u32 %v1168_v24, %v995_v23 }
  0x24   : > { %601 = vmatpush.bf16.msra.mxu1 %v1084_v60  ;;  %v337_v29 = vld [vmem:[%s1468_s2] sm:$0xff]  ;;  %v1005_v33 = vld [vmem:[%s1290_s29 + $0x18] sm:$0xf0]  ;;  %v1185_v34 = vld [vmem:[%s1290_s29 + $0x94] sm:$0xf]  ;;  %v1235_v35 = vmov 0   ;;  %v1060_v43 = vor.u32 %v1184_v28, %v1059_v27 }
  0x25   : > { %1217 = vset.pattern.permute.xlu1 %v1235_v35  ;;  %v1069_v36 = vld [vmem:[%s1290_s29 + $0x98] sm:$0xf0]  ;;  %v1201_v37 = vld [vmem:[%s1290_s29 + $0x114] sm:$0xf]  ;;  %1216 = vset.pattern.permute.xlu0 %v1235_v35  ;;  %v971_v40 = vld [vmem:[%s1467_s1] sm:$0xf]  ;;  %v1008_v44 = vor.u32 %v1169_v32, %v1005_v33 }
  0x26   : > { %583 = vmatpush.bf16.msra.mxu0 %v1012_v7  ;;  %343 = vperm.xlu1 %1217, %v337_v29   ;;  %v1133_v38 = vld [vmem:[%s1290_s29 + $0x118] sm:$0xf0]  ;;  %v1162_v41 = vld [vmem:[%s1467_s1 + $0x8] sm:$0xf0]  ;;  %v339_v42 = vld [vmem:[%s1468_s2 + $0x10] sm:$0xff]  ;;  %v1072_v47 = vor.u32 %v1185_v34, %v1069_v36 }
  0x27   : > { %657 = vmatpush.bf16.msrb.mxu2 %v1096_v1  ;;  %639 = vmatpush.bf16.msra.mxu3 %v1024_v11  ;;  %v1161_v45 = vld [vmem:[%s1467_s1 + $0x4] sm:$0xf]  ;;  %v973_v46 = vld [vmem:[%s1467_s1 + $0xc] sm:$0xf0]  ;;  %v997_v49 = vld [vmem:[%s1290_s29 + $0x8] sm:$0xf0]  ;;  %v1136_v51 = vor.u32 %v1201_v37, %v1133_v38  ;;  %v972_v52 = vor.u32 %v1162_v41, %v971_v40 }
  0x28   : > { %602 = vmatpush.bf16.msra.mxu1 %v1076_v10  ;;  %v1167_v48 = vld [vmem:[%s1290_s29 + $0x4] sm:$0xf]  ;;  %353 = vperm.xlu0 %1216, %v339_v42   ;;  %v1061_v53 = vld [vmem:[%s1290_s29 + $0x88] sm:$0xf0]  ;;  %v976_v56 = vor.u32 %v1161_v45, %v973_v46  ;;  %v340_v61 = vld [vmem:[%s1468_s2 + $0x18] sm:$0xff] }
  0x29   : > { %v1183_v50 = vld [vmem:[%s1290_s29 + $0x84] sm:$0xf]  ;;  %v1125_v55 = vld [vmem:[%s1290_s29 + $0x108] sm:$0xf0]  ;;  %1218 = vset.pattern.permute.xlu2 %v1235_v35  ;;  %v1000_v58 = vor.u32 %v1167_v48, %v997_v49  ;;  %v983_v62 = vld [vmem:[%s1467_s1 + $0x18] sm:$0xf] }
  0x2a   : > { %1138 = vmatmul.msk.bf16.gmra.mxu2 %vm571_vm0, %v1364_v21  ;;  %584 = vmatpush.bf16.msra.mxu0 %v1004_v22  ;;  %v1199_v54 = vld [vmem:[%s1290_s29 + $0x104] sm:$0xf]  ;;  %v338_v57 = vld [vmem:[%s1468_s2 + $0x8] sm:$0xff]  ;;  %v1064_v59 = vor.u32 %v1183_v50, %v1061_v53  ;;  %v1164_v0 = vld [vmem:[%s1467_s1 + $0x1c] sm:$0xf] }
  0x2b   : > { %658 = vmatpush.bf16.msrb.mxu2 %v1088_v15  ;;  %640 = vmatpush.bf16.msra.mxu3 %v1016_v26  ;;  %v1128_v60 = vor.u32 %v1199_v54, %v1125_v55  ;;  %v1165_v63 = vld [vmem:[%s1467_s1 + $0x20] sm:$0xf0]  ;;  %v985_v1 = vld [vmem:[%s1467_s1 + $0x24] sm:$0xf0] }
  0x2c   : > { %603 = vmatpush.bf16.msra.mxu1 %v1068_v25  ;;  %v984_v2 = vor.u32 %v1165_v63, %v983_v62  ;;  %v988_v3 = vor.u32 %v1164_v0, %v985_v1  ;;  %v1203_v45 = vld [vmem:[%s1469_s3] sm:$0xff] }
  0x2d   : > { %v706_v48 = vld [vmem:[%s1470_s4] sm:$0xff] }
  0x2e   : > { %585 = vmatpush.bf16.msra.mxu0 %v996_v39  ;;  %348 = vperm.xlu1 %1217, %v338_v57  }
  0x2f   : > { %659 = vmatpush.bf16.msrb.mxu2 %v1080_v30  ;;  %641 = vmatpush.bf16.msra.mxu3 %v1008_v44  ;;  %v707_v44 = vld [vmem:[%s1470_s4 + $0x8] sm:$0x7f] }
  0x30   : > { %604 = vmatpush.bf16.msra.mxu1 %v1060_v43  ;;  %358 = vperm.xlu0 %1216, %v340_v61  }
  0x31   : > { %586 = vmatmul.bf16.vlgmr.msra.gmra.mxu0 %v972_v52  ;;  %715 = vperm.xlu2 %1218, %v707_v44  }
  0x32   : > { %679 = vmatpush.bf16.msrb.mxu0 %v1136_v51 }
  0x33   : > { %660 = vmatpush.bf16.msrb.mxu2 %v1072_v47  ;;  %605 = vmatmul.bf16.vlgmr.msra.gmra.mxu1 %v976_v56 }
  0x34   : > { %642 = vmatpush.bf16.msra.mxu3 %v1000_v58 }
  0x36   : > { %680 = vmatpush.bf16.msrb.mxu0 %v1128_v60 }
  0x37   : > { %661 = vmatpush.bf16.msrb.mxu2 %v1064_v59  ;;  %643 = vmatmul.bf16.vlgmr.msra.gmra.mxu3 %v972_v52 }
  0x39   : > { %710 = vperm.xlu2 %1218, %v706_v48  }
  0x3a   : > { %662 = vmatmul.bf16.vlgmr.msrb.gmra.mxu2 %v976_v56 }
  0x3b   : > { %1204 = vmatpush.bf16.msra.mxu2 %v1136_v51 }
  0x3f   : > { %1205 = vmatpush.bf16.msra.mxu2 %v1128_v60 }
  0x41   : > { %591 = vmatmul.bf16.gmra.mxu0 %v984_v2 }
  0x43   : > { %610 = vmatmul.bf16.gmra.mxu1 %v988_v3 }
  0x47   : > { %648 = vmatmul.bf16.gmra.mxu3 %v984_v2 }
  0x4a   : > { %667 = vmatmul.bf16.gmra.mxu2 %v988_v3 }
  0x51   : > { %1139 = vmatmul.msk.bf16.vlgmr.msrb.gmra.mxu0 %vm571_vm0, %v1319_v31 }
  0x5a   : > { %1140 = vmatmul.msk.bf16.vlgmr.msra.gmra.mxu2 %vm571_vm0, %v1364_v21 }
  0x98   : > { %v344_v10 = vpop.permute.xlu1 %343 }
  0x9a   : > { %v354_v13 = vpop.permute.xlu0 %353 }
  0x9d   : > { %v625_v4 = vpop.f32.mrf.mxu2 }
  0xa0   : > { %v349_v18 = vpop.permute.xlu1 %348 }
  0xa2   : > { %v359_v20 = vpop.permute.xlu0 %358 }
  0xa5   : > { %v627_v5 = vpop.f32.mrf.mxu2 }
  0xad   : > { %v630_v6 = vpop.f32.mrf.mxu2 }
  0xae   : > { %v587_v7 = vpop.f32.mrf.mxu0 }
  0xaf   : > { %v588_v22 = vadd.f32 %v587_v7, %v344_v10 }
  0xb0   : > { %v606_v8 = vpop.f32.mrf.mxu1 }
  0xb1   : > { %v607_v28 = vadd.f32 %v606_v8, %v588_v22  ;;  %v716_v8 = vpop.permute.xlu2 %715 }
  0xb3   : > { %v626_v35 = vadd.f32 %v625_v4, %v607_v28 }
  0xb5   : > { %v632_v9 = vpop.f32.mrf.mxu2  ;;  %v692_v41 = vmax.f32 %v626_v35, 0.0 }
  0xb6   : > { %v589_v11 = vpop.f32.mrf.mxu0 }
  0xb7   : > { %v590_v31 = vadd.f32 %v589_v11, %v349_v18 }
  0xb8   : > { %v608_v12 = vpop.f32.mrf.mxu1 }
  0xb9   : > { %v609_v25 = vadd.f32 %v608_v12, %v590_v31 }
  0xba   : > { %v644_v16 = vpop.f32.mrf.mxu3 }
  0xbb   : > { %v628_v33 = vadd.f32 %v627_v5, %v609_v25  ;;  %v645_v54 = vadd.f32 %v644_v16, %v344_v10 }
  0xbd   : > { %v663_v14 = vpop.f32.mrf.mxu2  ;;  %v694_v39 = vmax.f32 %v628_v33, 0.0 }
  0xbe   : > { %v592_v15 = vpop.f32.mrf.mxu0  ;;  %v664_v61 = vadd.f32 %v663_v14, %v645_v54 }
  0xbf   : > { %v593_v19 = vadd.f32 %v592_v15, %v354_v13  ;;  %v702_v43 = vpack.c.bf16 %v694_v39, %v692_v41  ;;  %v711_v15 = vpop.permute.xlu2 %710 }
  0xc0   : > { %v611_v17 = vpop.f32.mrf.mxu1 }
  0xc1   : > { %v612_v21 = vadd.f32 %v611_v17, %v593_v19 }
  0xc2   : > { %v646_v30 = vpop.f32.mrf.mxu3 }
  0xc3   : > { %v631_v29 = vadd.f32 %v630_v6, %v612_v21  ;;  %v647_v52 = vadd.f32 %v646_v30, %v349_v18  ;;  %v1438_v18 = vld [vmem:[%s1471_s5 + $0x10] sm:$0x77] }
  0xc5   : > { %v665_v23 = vpop.f32.mrf.mxu2  ;;  %v696_v36 = vmax.f32 %v631_v29, 0.0 }
  0xc6   : > { %v594_v24 = vpop.f32.mrf.mxu0  ;;  %v666_v57 = vadd.f32 %v665_v23, %v647_v52 }
  0xc7   : > { %v595_v26 = vadd.f32 %v594_v24, %v359_v20  ;;  %v1149_v24 = vld [vmem:[%s1471_s5 + $0x18] sm:$0x77] }
  0xc8   : > { %v613_v27 = vpop.f32.mrf.mxu1 }
  0xc9   : > { %v614_v32 = vadd.f32 %v613_v27, %v595_v26 }
  0xca   : > { %v649_v42 = vpop.f32.mrf.mxu3 }
  0xcb   : > { %v633_v34 = vadd.f32 %v632_v9, %v614_v32  ;;  %v650_v51 = vadd.f32 %v649_v42, %v354_v13 }
  0xcd   : > { %v698_v37 = vmax.f32 %v633_v34, 0.0  ;;  %v668_v38 = vpop.f32.mrf.mxu2 }
  0xce   : > { %v682_v47 = vpop.f32.mrf.mxu0  ;;  %v669_v55 = vadd.f32 %v668_v38, %v650_v51 }
  0xcf   : > { %v704_v40 = vpack.c.bf16 %v698_v37, %v696_v36  ;;  %v683_v0 = vadd.f32 %v682_v47, %v664_v61 }
  0xd1   : > { %732 = vmatpush.bf16.msrb.mxu1 %v704_v40  ;;  %v693_v5 = vmax.f32 %v683_v0, 0.0 }
  0xd2   : > { %v651_v49 = vpop.f32.mrf.mxu3 }
  0xd3   : > { %v652_v53 = vadd.f32 %v651_v49, %v359_v20  ;;  %v1147_v49 = vld [vmem:[%s1471_s5 + $0x8] sm:$0x77] }
  0xd5   : > { %v670_v46 = vpop.f32.mrf.mxu2  ;;  %733 = vmatpush.bf16.msrb.mxu1 %v702_v43 }
  0xd6   : > { %v684_v56 = vpop.f32.mrf.mxu0  ;;  %v671_v58 = vadd.f32 %v670_v46, %v652_v53 }
  0xd7   : > { %v685_v62 = vadd.f32 %v684_v56, %v666_v57 }
  0xd8   : > { %1145 = vmatmul.msk.bf16.vlgmr.msrb.gmra.mxu1 %vm571_vm0, %v1203_v45 }
  0xd9   : > { %v695_v3 = vmax.f32 %v685_v62, 0.0 }
  0xdb   : > { %v703_v6 = vpack.c.bf16 %v695_v3, %v693_v5 }
  0xdd   : > { %v687_v50 = vpop.f32.mrf.mxu2 }
  0xde   : > { %v688_v59 = vadd.f32 %v687_v50, %v669_v55 }
  0xe0   : > { %v697_v1 = vmax.f32 %v688_v59, 0.0 }
  0xe5   : > { %v689_v60 = vpop.f32.mrf.mxu2 }
  0xe6   : > { %v690_v63 = vadd.f32 %v689_v60, %v671_v58  ;;  %v766_v60 = vld [vmem:[%s1471_s5] sm:$0x77] }
  0xe8   : > { %v699_v2 = vmax.f32 %v690_v63, 0.0 }
  0xea   : > { %v705_v4 = vpack.c.bf16 %v699_v2, %v697_v1 }
  0xec   : > { %746 = vmatpush.bf16.msrb.mxu3 %v705_v4 }
  0xf0   : > { %747 = vmatpush.bf16.msrb.mxu3 %v703_v6 }
  0xf3   : > { %1146 = vmatmul.msk.bf16.vlgmr.msrb.gmra.mxu3 %vm571_vm0, %v1203_v45 }
 0x155   : > { %v735_v7 = vpop.f32.mrf.mxu1 }
 0x156   : > { %v736_v19 = vadd.f32 %v735_v7, %v711_v15 }
 0x158   : > { %v754_v21 = vmin.f32 %v736_v19, 4.1351666 }
 0x15a   : > { %v813_v26 = vmul.f32 1.442695, %v754_v21 }
 0x15d   : > { %v737_v9 = vpop.f32.mrf.mxu1 }
 0x15e   : > { %v738_v10 = vadd.f32 %v737_v9, %v716_v8 }
 0x160   : > { %v756_v11 = vmin.f32 %v738_v10, 4.1351666  ;;  %760 = vst.sshfl [vmem:[#allocation1] sm:$0xff pattern:$0x75316420] %v738_v10 }
 0x162   : > { %v817_v12 = vmul.f32 1.442695, %v756_v11 }
 0x164   : > { %1219 = vpow2.f32 %v817_v12 }
 0x16a   : > { %v1220_v13 = vpop.eup %1219 }
 0x16b   : > { %827 = vst.sshfl [vmem:[#allocation1 + $0x10] sm:$0xff pattern:$0x75316420] %v1220_v13 }
 0x176   : > { %v749_v14 = vpop.f32.mrf.mxu3 }
 0x177   : > { %v750_v20 = vadd.f32 %v749_v14, %v711_v15 }
 0x179   : > { %v755_v23 = vmin.f32 %v750_v20, 4.1351666 }
 0x17b   : > { %v815_v28 = vmul.f32 1.442695, %v755_v23 }
 0x17e   : > { %v751_v16 = vpop.f32.mrf.mxu3 }
 0x17f   : > { %v752_v17 = vadd.f32 %v751_v16, %v716_v8 }
 0x181   : > { %v757_v31 = vmin.f32 %v752_v17, 4.1351666  ;;  %761 = vst.sshfl [vmem:[#allocation1 + $0x8] sm:$0xff pattern:$0x75316420] %v752_v17 }
 0x182   : > { %774 = vst [vmem:[#allocation1] ss:$2 sm:$0xff] %v1438_v18 }
 0x183   : > { %v819_v22 = vmul.f32 1.442695, %v757_v31 }
 0x185   : > { %1221 = vpow2.f32 %v819_v22 }
 0x186   : > { %1223 = vpow2.f32 %v813_v26 }
 0x187   : > { %1225 = vpow2.f32 %v815_v28 }
 0x188   : > { %v763_v25 = vld [vmem:[#allocation1 + $0x1] ss:$2 sm:$0xff] }
 0x189   : > { %765 = vst [vmem:[%s286_s9] sm:$0x77] %v763_v25  ;;  %v775_v27 = vld.sshfl [vmem:[#allocation1] sm:$0xff pattern:$0x75316420] }
 0x18a   : > { %v776_v29 = vld.sshfl [vmem:[#allocation1 + $0x8] sm:$0xff pattern:$0x75316420]  ;;  %v779_v54 = vmul.f32 %v775_v27, %v736_v19 }
 0x18b   : > { %v1222_v30 = vpop.eup %1221  ;;  %789 = vst [vmem:[#allocation1] ss:$2 sm:$0xff] %v1149_v24  ;;  %v780_v42 = vmul.f32 %v776_v29, %v750_v20 }
 0x18c   : > { %828 = vst.sshfl [vmem:[#allocation1 + $0x18] sm:$0xff pattern:$0x75316420] %v1222_v30  ;;  %v842_v32 = vrot.slane %v1222_v30, 4  ;;  %v1224_v33 = vpop.eup %1223 }
 0x18d   : > { %v1226_v37 = vpop.eup %1225  ;;  %v783_v50 = vrot.slane %v780_v42, 4 }
 0x18e   : > { %v843_v36 = vsel %vm784_vm1, %v1220_v13, %v842_v32 }
 0x18f   : > { %v1153_v41 = vrot.slane %v843_v36, 9  ;;  %v785_v61 = vsel %vm784_vm1, %v779_v54, %v783_v50 }
 0x190   : > { %v787_v2 = vadd.f32 %v785_v61, %v766_v60 }
 0x191   : > { %v847_v48 = vmul.f32 %v1153_v41, %v1149_v24 }
 0x192   : > { %v790_v34 = vld.sshfl [vmem:[#allocation1] sm:$0xff pattern:$0x75316420]  ;;  %v791_v35 = vld.sshfl [vmem:[#allocation1 + $0x8] sm:$0xff pattern:$0x75316420] }
 0x193   : > { %v792_v38 = vrot.slane %v790_v34, 5  ;;  %v793_v39 = vrot.slane %v791_v35, 5  ;;  %825 = vst.sshfl [vmem:[#allocation1] sm:$0xff pattern:$0x75316420] %v1224_v33  ;;  %v852_v59 = vmul.f32 0.5, %v847_v48 }
 0x194   : > { %826 = vst.sshfl [vmem:[#allocation1 + $0x8] sm:$0xff pattern:$0x75316420] %v1226_v37  ;;  %v832_v47 = vld [vmem:[#allocation1 + $0x10] ss:$2 sm:$0xff] }
 0x195   : > { %v797_v40 = vmul.f32 %v793_v39, %v750_v20  ;;  %v796_v43 = vmul.f32 %v792_v38, %v736_v19  ;;  %v838_v57 = vrot.slane %v832_v47, 6 }
 0x197   : > { %v800_v44 = vrot.slane %v797_v40, 4 }
 0x199   : > { %v801_v45 = vsel %vm784_vm1, %v796_v43, %v800_v44  ;;  %v802_v46 = vsel %vm784_vm1, %v800_v44, %v796_v43 }
 0x19a   : > { %v1150_v51 = vrot.slane %v801_v45, 11  ;;  %v1151_v52 = vrot.slane %v802_v46, 11 }
 0x19b   : > { %v830_v53 = vld [vmem:[#allocation1 + $0x1] ss:$2 sm:$0xff] }
 0x19c   : > { %v810_v55 = vsel %vm806_vm6, %v1150_v51, %v1151_v52  ;;  %v1152_v56 = vrot.slane %v830_v53, 10 }
 0x19d   : > { %v812_v58 = vadd.f32 %v1147_v49, %v810_v55 }
 0x19e   : > { %v839_v62 = vsel %vm835_vm7, %v1152_v56, %v838_v57 }
 0x19f   : > { %v841_v63 = vmul.f32 %v1438_v18, %v839_v62  ;;  %v853_v0 = vsub.f32 %v812_v58, %v852_v59  ;;  %v859_v1 = vadd.f32 %v852_v59, %v812_v58 }
 0x1a1   : > { %v848_v3 = vmul.f32 0.5, %v841_v63  ;;  %v854_v4 = vmax.f32 %v853_v0, 0.0  ;;  %v860_v5 = vmax.f32 %v859_v1, 0.0 }
 0x1a3   : > { %v849_v6 = vsub.f32 %v787_v2, %v848_v3  ;;  %v855_v7 = vmin.f32 %v854_v4, 256.0  ;;  %v856_v8 = vadd.f32 %v848_v3, %v787_v2  ;;  %v861_v9 = vmin.f32 %v860_v5, 256.0 }
 0x1a5   : > { %v850_v10 = vmax.f32 %v849_v6, 0.0  ;;  %v857_v11 = vmax.f32 %v856_v8, 0.0  ;;  %1154 = vst [vmem:[%s291_s18 + $0x8] sm:$0x77] %v855_v7  ;;  %v868_v12 = vsub.f32 %v861_v9, %v855_v7 }
 0x1a7   : > { %v851_v13 = vmin.f32 %v850_v10, 256.0  ;;  %v858_v14 = vmin.f32 %v857_v11, 256.0  ;;  %1156 = vst [vmem:[%s291_s18 + $0x18] sm:$0x77] %v868_v12 }
 0x1a9   : > { %862 = vst [vmem:[%s291_s18] sm:$0x77] %v851_v13  ;;  %v865_v15 = vsub.f32 %v858_v14, %v851_v13 }
 0x1ab   : > { %1155 = vst [vmem:[%s291_s18 + $0x10] sm:$0x77] %v865_v15 }
 0x1ac PF: > { %s18_s24 = sadd.s32 1, %s1233_s24  }
 0x1ad   : > { %p15_p4 = scmp.ge.s32.totalorder %s18_s24, 4  }
 0x1af   :  { %17 = sbr.rel (!%p15_p4) target bundleno = 1 (0x1), region = 95 }

</bundles_post_ra>
